<compile_context>
chip_gen: v7x
topology: tpu7x:2x2x1
jax: 0.10.0
libtpu: 0.0.40
codegen_flags: <defaults>
</compile_context>

<pallas_src>
import jax
import jax.numpy as jnp
from jax.experimental import pallas as pl
from jax.experimental.pallas import tpu as pltpu

INPUT_SIZE = 28 * 28   # 784
OUTPUT_SIZE = 10
OUT_PADDED = 128       # lane-dense output width (pad 10 -> 128)


def _round_up(n, m):
    return ((n + m - 1) // m) * m


def _linear_kernel(x_ref, wt_ref, b_ref, o_ref):
    # x tile (TB, IN) f32 -> bf16 for the MXU; weight already bf16 & lane-padded.
    x = x_ref[...].astype(wt_ref.dtype)                       # (TB, IN) bf16
    acc = jnp.dot(x, wt_ref[...],
                  preferred_element_type=jnp.float32)         # (TB, 128) f32
    acc = acc + b_ref[...]                                    # f32 epilogue (v5e-safe)
    o_ref[...] = acc.astype(o_ref.dtype)


def pack_params(weight, bias, param_dtype=jnp.bfloat16):
    """One-time repack of torch-layout params.

    weight: (OUT, IN) f32, bias: (OUT,) f32  ->
      wt_packed: (IN, OUT_PADDED) param_dtype (transposed, zero-padded lanes)
      b_packed : (1, OUT_PADDED) f32
    """
    out_f, in_f = weight.shape
    wt = jnp.zeros((in_f, OUT_PADDED), dtype=param_dtype)
    wt = wt.at[:, :out_f].set(weight.T.astype(param_dtype))
    b = jnp.zeros((1, OUT_PADDED), dtype=jnp.float32)
    b = b.at[:, :out_f].set(bias.astype(jnp.float32))
    return wt, b


def simple_perceptron_forward(x, wt_packed, b_packed, out_features=OUTPUT_SIZE):
    """x: (B, IN) f32; wt_packed: (IN, 128) bf16; b_packed: (1, 128) f32."""
    B, IN = x.shape

    # Batch tile: multiple of 8 (f32 sublane), capped so double-buffered tiles
    # fit the default scoped VMEM on v5e/v6e/v7x.
    tb = min(512, _round_up(B, 8))
    B_pad = _round_up(B, tb)
    if B_pad != B:
        x = jnp.pad(x, ((0, B_pad - B), (0, 0)))

    out_padded = pl.pallas_call(
        _linear_kernel,
        out_shape=jax.ShapeDtypeStruct((B_pad, OUT_PADDED), x.dtype),
        grid_spec=pltpu.PrefetchScalarGridSpec(
            num_scalar_prefetch=0,
            grid=(B_pad // tb,),
            in_specs=[
                pl.BlockSpec((tb, IN), lambda i: (i, 0)),            # stream x tiles
                pl.BlockSpec((IN, OUT_PADDED), lambda i: (0, 0)),    # weight resident
                pl.BlockSpec((1, OUT_PADDED), lambda i: (0, 0)),     # bias resident
            ],
            out_specs=pl.BlockSpec((tb, OUT_PADDED), lambda i: (i, 0)),
        ),
        compiler_params=pltpu.CompilerParams(
            # Batch tiles are independent -> parallel (v7x: 2 TCs split the work).
            dimension_semantics=("parallel",),
        ),
    )(x, wt_packed, b_packed)

    return out_padded[:B, :out_features]


if __name__ == "__main__":
    key = jax.random.PRNGKey(0)
    k_x, k_w, k_b = jax.random.split(key, 3)

    batch = 8
    # nn.Linear default init: uniform(-1/sqrt(in), 1/sqrt(in)).
    bound = 1.0 / jnp.sqrt(jnp.float32(INPUT_SIZE))
    weight = jax.random.uniform(
        k_w, (OUTPUT_SIZE, INPUT_SIZE), dtype=jnp.float32, minval=-bound, maxval=bound
    )
    bias = jax.random.uniform(
        k_b, (OUTPUT_SIZE,), dtype=jnp.float32, minval=-bound, maxval=bound
    )
    x = jax.random.normal(k_x, (batch, INPUT_SIZE), dtype=jnp.float32)

    # One-time parameter repack (done at init, not per forward call).
    wt_packed, b_packed = pack_params(weight, bias)

    out = simple_perceptron_forward(x, wt_packed, b_packed)
    out = jax.block_until_ready(out)

    # Reference: same math as torch F.linear (f32). bf16 weights -> loosened tol.
    ref = x @ weight.T + bias
    assert out.shape == (batch, OUTPUT_SIZE)
    assert jnp.allclose(out, ref, atol=2e-2, rtol=2e-2), (
        float(jnp.max(jnp.abs(out - ref)))
    )

    print("KERNEL_OK")
</pallas_src>

<mosaic_0001>
module attributes {stable_mosaic.version = 11 : i64} {
  func.func @_linear_kernel(%arg0: i32, %arg1: memref<8x784xf32, #tpu.memory_space<vmem>>, %arg2: memref<784x128xbf16, #tpu.memory_space<vmem>>, %arg3: memref<1x128xf32, #tpu.memory_space<vmem>>, %arg4: memref<8x128xf32, #tpu.memory_space<vmem>>) attributes {dimension_semantics = [#tpu.dimension_semantics<parallel>], iteration_bounds = array<i64: 1>, scalar_prefetch = 0 : i64, scratch_operands = 0 : i64, tpu.core_type = #tpu.core_type<tc>, window_params = [{transform_indices = @transform_0, window_bounds = array<i64: 8, 784>}, {pipeline_mode = #tpu.pipeline_mode<synchronous>, transform_indices = @transform_1, window_bounds = array<i64: 784, 128>}, {pipeline_mode = #tpu.pipeline_mode<synchronous>, transform_indices = @transform_2, window_bounds = array<i64: 1, 128>}, {transform_indices = @transform_3, window_bounds = array<i64: 8, 128>}]} {
    %c0 = arith.constant 0 : index
    %c0_0 = arith.constant 0 : index
    %0 = vector.load %arg1[%c0, %c0_0] : memref<8x784xf32, #tpu.memory_space<vmem>>, vector<8x784xf32>
    %1 = arith.truncf %0 : vector<8x784xf32> to vector<8x784xbf16>
    %c0_1 = arith.constant 0 : index
    %c0_2 = arith.constant 0 : index
    %2 = vector.load %arg2[%c0_1, %c0_2] : memref<784x128xbf16, #tpu.memory_space<vmem>>, vector<784x128xbf16>
    %cst = arith.constant dense<0.000000e+00> : vector<8x128xf32>
    %3 = tpu.matmul %1, %2, %cst {dimension_numbers = #tpu.dot_dimension_numbers<[1], [0], [0], [1], [0, 0, 1, 1], [], []>} : vector<8x784xbf16>, vector<784x128xbf16>, vector<8x128xf32> -> vector<8x128xf32>
    %c0_3 = arith.constant 0 : index
    %c0_4 = arith.constant 0 : index
    %4 = vector.load %arg3[%c0_3, %c0_4] : memref<1x128xf32, #tpu.memory_space<vmem>>, vector<1x128xf32>
    %5 = vector.broadcast %4 : vector<1x128xf32> to vector<8x128xf32>
    %6 = arith.addf %3, %5 : vector<8x128xf32>
    %c0_5 = arith.constant 0 : index
    %c0_6 = arith.constant 0 : index
    %7 = vector.load %arg4[%c0_5, %c0_6] : memref<8x128xf32, #tpu.memory_space<vmem>>, vector<8x128xf32>
    tpu.vector_store %arg4[%c0_5, %c0_6], %6 {strides = array<i32>} : memref<8x128xf32, #tpu.memory_space<vmem>>, vector<8x128xf32>,
    return
  }
  func.func @transform_0(%arg0: i32) -> (i32, i32) {
    %c0_i32 = arith.constant 0 : i32
    %c0_i32_0 = arith.constant 0 : i32
    return %arg0, %c0_i32 : i32, i32
  }
  func.func @transform_1(%arg0: i32) -> (i32, i32) {
    %c0_i32 = arith.constant 0 : i32
    %c0_i32_0 = arith.constant 0 : i32
    %c0_i32_1 = arith.constant 0 : i32
    return %c0_i32, %c0_i32_0 : i32, i32
  }
  func.func @transform_2(%arg0: i32) -> (i32, i32) {
    %c0_i32 = arith.constant 0 : i32
    %c0_i32_0 = arith.constant 0 : i32
    %c0_i32_1 = arith.constant 0 : i32
    return %c0_i32, %c0_i32_0 : i32, i32
  }
  func.func @transform_3(%arg0: i32) -> (i32, i32) {
    %c0_i32 = arith.constant 0 : i32
    %c0_i32_0 = arith.constant 0 : i32
    return %arg0, %c0_i32 : i32, i32
  }
}

</mosaic_0001>

<bundles_post_ra>
// kernel: tpu_custom_call.1
= control target key start
LH: loop header
LB: loop body
LE: loop exit
PB: predicated region body
PF: predicated region fallthrough
CT: control target
= control target key end

     0   :  { %8 = vsyncpa [#allocation3], 0  ;;  %s962_s0 = inlined_call_operand.hbm [shape: f32[8,784], index: 0, kind: input, shape index: {}]   ;;  %s963_s1 = inlined_call_operand.hbm [shape: bf16[784,128], index: 1, kind: input, shape index: {}]   ;;  %s964_s2 = inlined_call_operand.vmem [shape: f32[1,128], index: 2, kind: input, shape index: {}]   ;;  %s965_s3 = inlined_call_operand.hbm [shape: f32[8,128], index: 3, kind: output, shape index: {}]  }
   0x1   :  { %9 = vsyncpa [#allocation6], 0 }
   0x2   :  { %10 = vsyncpa [#allocation4], 0  ;;  %s889_s12 = smov [#allocation2]   ;;  %s890_s14 = smov [#allocation5]  }
   0x3   :  { %s17_s13 = sshll.u32 %s889_s12, 4  ;;  %s26_s15 = sshll.u32 %s890_s14, 4  ;;  %s18_s13 = int_to_ptr.vmem [resolvable:$true] %s17_s13  ;;  %s916_s15 = int_to_ptr.vmem [resolvable:$true] %s26_s15 }
   0x4   :  { %s817_s18 = scalar_lea.hbm %s962_s0, 896 }
   0x5   :  { %p818_p0 = scmp.ne.s32.totalorder %s962_s0, %s817_s18  ;;  %p821_p1 = scmp.lt.u32.totalorder %s817_s18, %s962_s0 }
   0x7   :  { %p823_p2 = pnand %p821_p1, %p818_p0 }
   0x9   :  { %826 = shalt.err (!%p823_p2)
}
   0xa   :  { %s827_s23 = scalar_lea.vmem %s18_s13, 896  ;;  %p832_p4 = scmp.lt.s32.totalorder %s18_s13, %s18_s13 }
   0xb   :  { %p828_p3 = scmp.ne.s32.totalorder %s18_s13, %s827_s23  ;;  %p833_p5 = scmp.lt.s32.totalorder %s827_s23, %s827_s23 }
   0xd   :  { %p834_p6 = por %p833_p5, %p832_p4 }
   0xf   :  { %p835_p7 = pnand %p834_p6, %p828_p3 }
  0x11   :  { %838 = shalt.err (!%p835_p7)
}
  0x12   :  { %20 = dma.hbm_to_vmem [thread:$0]  %s962_s0, 896, %s18_s13, [#allocation3]  }
  0x13   :  { %s839_s28 = scalar_lea.hbm %s963_s1, 6272 }
  0x14   :  { %p840_p8 = scmp.ne.s32.totalorder %s963_s1, %s839_s28  ;;  %p843_p9 = scmp.lt.u32.totalorder %s839_s28, %s963_s1 }
  0x16   :  { %p845_p10 = pnand %p843_p9, %p840_p8 }
  0x18   :  { %848 = shalt.err (!%p845_p10)
}
  0x19   :  { %s849_s6 = scalar_lea.vmem %s916_s15, 6272  ;;  %p854_p12 = scmp.lt.s32.totalorder %s916_s15, %s916_s15 }
  0x1a   :  { %p850_p11 = scmp.ne.s32.totalorder %s916_s15, %s849_s6  ;;  %p855_p13 = scmp.lt.s32.totalorder %s849_s6, %s849_s6 }
  0x1c   :  { %p856_p0 = por %p855_p13, %p854_p12 }
  0x1e   :  { %p857_p1 = pnand %p856_p0, %p850_p11 }
  0x20   :  { %860 = shalt.err (!%p857_p1)
}
  0x21   :  { %s891_s0 = smov 64   ;;  %s892_s7 = smov 4  }
  0x22   :  { %32 = dma.hbm_to_vmem [thread:$0]  %s963_s1, 6272, %s916_s15, [#allocation6], %s891_s0, %s891_s0, %s892_s7  }
  0x23   :  { %883 = dma.done.wait [#allocation3], 896  }
  0x24   :  { %884 = vsyncadd [#allocation3], 4294966400 }
  0x25   :  { %885 = dma.done.wait [#allocation6], 6272  }
  0x26   :  { %886 = vsyncadd [#allocation6], 4294961024  ;;  %v768_v0 = vld [vmem:[#allocation5 + $0x40] sm:$0xff]   ;;  %v772_v4 = vld [vmem:[#allocation5 + $0x48] sm:$0xff]   ;;  %v893_v44 = vmov 0.0   ;;  %vm894_vm0 = vmmov 0  }
  0x27   :  { %v769_v1 = vld [vmem:[#allocation5] sm:$0xff]   ;;  %687 = vmatprep.subr.bf16.mxu0 %v768_v0  ;;  %v773_v5 = vld [vmem:[#allocation5 + $0x8] sm:$0xff]   ;;  %v776_v8 = vld [vmem:[#allocation5 + $0x50] sm:$0xff]   ;;  %vm455_vm1 = vcmask 130048  }
  0x28   :  { %v770_v2 = vld [vmem:[#allocation5 + $0xc0] sm:$0xff]   ;;  %688 = vmatpush3.bf16.msra.mxu0 %v769_v1  ;;  %v774_v6 = vld [vmem:[#allocation5 + $0xc8] sm:$0xff]   ;;  %v777_v9 = vld [vmem:[#allocation5 + $0x10] sm:$0xff]  }
  0x29   :  { %v771_v3 = vld [vmem:[#allocation5 + $0x80] sm:$0xff]   ;;  %709 = vmatprep.subr.bf16.mxu1 %v770_v2  ;;  %689 = vmatprep.subr.bf16.mxu0 %v772_v4  ;;  %v775_v7 = vld [vmem:[#allocation5 + $0x88] sm:$0xff]   ;;  %v778_v10 = vld [vmem:[#allocation5 + $0xd0] sm:$0xff]  }
  0x2a   :  { %710 = vmatpush3.bf16.msra.mxu1 %v771_v3  ;;  %v779_v11 = vld [vmem:[#allocation5 + $0x90] sm:$0xff]   ;;  %v780_v12 = vld [vmem:[#allocation5 + $0x58] sm:$0xff]   ;;  %v784_v16 = vld [vmem:[#allocation5 + $0x60] sm:$0xff]  }
  0x2b   :  { %711 = vmatprep.subr.bf16.mxu1 %v774_v6  ;;  %v781_v13 = vld [vmem:[#allocation5 + $0x18] sm:$0xff]   ;;  %v785_v17 = vld [vmem:[#allocation5 + $0x20] sm:$0xff]   ;;  %v788_v20 = vld [vmem:[#allocation5 + $0x68] sm:$0xff]  }
  0x2c   :  { %690 = vmatpush3.bf16.msra.mxu0 %v773_v5  ;;  %v782_v14 = vld [vmem:[#allocation5 + $0xd8] sm:$0xff]   ;;  %v786_v18 = vld [vmem:[#allocation5 + $0xe0] sm:$0xff]   ;;  %v789_v21 = vld [vmem:[#allocation5 + $0x28] sm:$0xff]  }
  0x2d   :  { %691 = vmatprep.subr.bf16.mxu0 %v776_v8  ;;  %v783_v15 = vld [vmem:[#allocation5 + $0x98] sm:$0xff]   ;;  %v787_v19 = vld [vmem:[#allocation5 + $0xa0] sm:$0xff]   ;;  %v790_v22 = vld [vmem:[#allocation5 + $0xe8] sm:$0xff]  }
  0x2e   :  { %712 = vmatpush3.bf16.msra.mxu1 %v775_v7  ;;  %v791_v23 = vld [vmem:[#allocation5 + $0xa8] sm:$0xff]   ;;  %v792_v24 = vld [vmem:[#allocation5 + $0x70] sm:$0xff]   ;;  %v796_v28 = vld [vmem:[#allocation5 + $0x78] sm:$0xff]  }
  0x2f   :  { %713 = vmatprep.subr.bf16.mxu1 %v778_v10  ;;  %v793_v25 = vld [vmem:[#allocation5 + $0x30] sm:$0xff]   ;;  %v797_v29 = vld [vmem:[#allocation5 + $0x38] sm:$0xff]   ;;  %v42_v34 = vld [vmem:[#allocation2] sm:$0xff] }
  0x30   :  { %692 = vmatpush3.bf16.msra.mxu0 %v777_v9  ;;  %v794_v26 = vld [vmem:[#allocation5 + $0xf0] sm:$0xff]   ;;  %v798_v30 = vld [vmem:[#allocation5 + $0xf8] sm:$0xff]   ;;  %v49_v35 = vpack.c.bf16 %v42_v34, %v42_v34  ;;  %v800_v36 = vld [vmem:[#allocation5 + $0x140] sm:$0xff]  }
  0x31   :  { %693 = vmatprep.subr.bf16.mxu0 %v780_v12  ;;  %v795_v27 = vld [vmem:[#allocation5 + $0xb0] sm:$0xff]   ;;  %v799_v33 = vld [vmem:[#allocation5 + $0xb8] sm:$0xff]   ;;  %v45_v37 = vld [vmem:[#allocation2 + $0x18] sm:$0xff] }
  0x32   :  { %714 = vmatpush3.bf16.msra.mxu1 %v779_v11  ;;  %v43_v31 = vld [vmem:[#allocation2 + $0x8] sm:$0xff]  ;;  %v52_v38 = vpack.c.bf16 %v45_v37, %v45_v37  ;;  %v801_v39 = vld [vmem:[#allocation5 + $0x100] sm:$0xff]   ;;  %v44_v40 = vld [vmem:[#allocation2 + $0x10] sm:$0xff] }
  0x33   :  { %715 = vmatprep.subr.bf16.mxu1 %v782_v14  ;;  %v50_v32 = vpack.c.bf16 %v43_v31, %v43_v31  ;;  %v51_v41 = vpack.c.bf16 %v44_v40, %v44_v40  ;;  %v802_v42 = vld [vmem:[#allocation5 + $0x148] sm:$0xff]   ;;  %v804_v45 = vld [vmem:[#allocation5 + $0x150] sm:$0xff]   ;;  %v806_v47 = vld [vmem:[#allocation5 + $0x158] sm:$0xff]  }
  0x34   :  { %694 = vmatpush3.bf16.msra.mxu0 %v781_v13  ;;  %531 = vmatprep.mubr.bf16.mxu1 %v52_v38  ;;  %v803_v43 = vld [vmem:[#allocation5 + $0x108] sm:$0xff]   ;;  %v805_v46 = vld [vmem:[#allocation5 + $0x110] sm:$0xff]   ;;  %v807_v48 = vld [vmem:[#allocation5 + $0x118] sm:$0xff]  }
  0x35   :  { %695 = vmatprep.subr.bf16.mxu0 %v784_v16  ;;  %491 = vmatprep.mubr.bf16.mxu0 %v50_v32  ;;  %v808_v49 = vld [vmem:[#allocation5 + $0x160] sm:$0xff]   ;;  %v810_v51 = vld [vmem:[#allocation5 + $0x168] sm:$0xff]   ;;  %v47_v53 = vld [vmem:[#allocation2 + $0x28] sm:$0xff] }
  0x36   :  { %716 = vmatpush3.bf16.msra.mxu1 %v783_v15  ;;  %v809_v50 = vld [vmem:[#allocation5 + $0x120] sm:$0xff]   ;;  %v54_v54 = vpack.c.bf16 %v47_v53, %v47_v53  ;;  %v48_v55 = vld [vmem:[#allocation2 + $0x30] sm:$0xff]  ;;  %v811_v56 = vld [vmem:[#allocation5 + $0x128] sm:$0xff]  }
  0x37   :  { %717 = vmatprep.subr.bf16.mxu1 %v786_v18  ;;  %v816_v52 = vld [vmem:[#allocation5 + $0x180] sm:$0xff]   ;;  %v55_v57 = vpack.c.bf16 %v48_v55, %v48_v55  ;;  %v812_v58 = vld [vmem:[#allocation5 + $0x170] sm:$0xff]   ;;  %v814_v60 = vld [vmem:[#allocation5 + $0x178] sm:$0xff]  }
  0x38   :  { %696 = vmatpush3.bf16.msra.mxu0 %v785_v17  ;;  %v813_v59 = vld [vmem:[#allocation5 + $0x130] sm:$0xff]   ;;  %v815_v61 = vld [vmem:[#allocation5 + $0x138] sm:$0xff]   ;;  %v46_v62 = vld [vmem:[#allocation2 + $0x20] sm:$0xff] }
  0x39   :  { %697 = vmatprep.subr.bf16.mxu0 %v788_v20  ;;  %v53_v63 = vpack.c.bf16 %v46_v62, %v46_v62  ;;  %v636_v1 = vld [vmem:[%s964_s2] ss:$0 sm:$0xff]  ;;  %s895_s2 = smov [#allocation7]  }
  0x3a   :  { %718 = vmatpush3.bf16.msra.mxu1 %v787_v19  ;;  %s626_s11 = sshll.u32 %s895_s2, 4  ;;  %s627_s11 = int_to_ptr.vmem [resolvable:$true] %s626_s11 }
  0x3b   :  { %719 = vmatprep.subr.bf16.mxu1 %v790_v22  ;;  %s861_s12 = scalar_lea.vmem %s627_s11, 128  ;;  %p866_p3 = scmp.lt.s32.totalorder %s627_s11, %s627_s11 }
  0x3c   :  { %698 = vmatpush3.bf16.msra.mxu0 %v789_v21  ;;  %p862_p2 = scmp.ne.s32.totalorder %s627_s11, %s861_s12  ;;  %p867_p4 = scmp.lt.s32.totalorder %s861_s12, %s861_s12 }
  0x3d   :  { %699 = vmatprep.subr.bf16.mxu0 %v792_v24 }
  0x3e   :  { %720 = vmatpush3.bf16.msra.mxu1 %v791_v23  ;;  %p868_p5 = por %p867_p4, %p866_p3 }
  0x3f   :  { %721 = vmatprep.subr.bf16.mxu1 %v794_v26 }
  0x40   :  { %700 = vmatpush3.bf16.msra.mxu0 %v793_v25  ;;  %p869_p6 = pnand %p868_p5, %p862_p2 }
  0x41   :  { %701 = vmatprep.subr.bf16.mxu0 %v796_v28 }
  0x42   :  { %722 = vmatpush3.bf16.msra.mxu1 %v795_v27 }
  0x43   :  { %723 = vmatprep.subr.bf16.mxu1 %v798_v30 }
  0x44   :  { %702 = vmatpush3.bf16.msra.mxu0 %v797_v29 }
  0x45   :  { %731 = vmatprep.subr.bf16.mxu0 %v800_v36 }
  0x46   :  { %724 = vmatpush3.bf16.msra.mxu1 %v799_v33 }
  0x47   :  { %492 = vmatmul.mubr.bf16.vlgmr.msra.gmra.mrb[0].mxu0 %v49_v35  ;;  %755 = vmatprep.subr.bf16.mxu1 %v893_v44 }
  0x48   :  { %732 = vmatpush3.bf16.msra.mxu0 %v801_v39  ;;  %571 = vmatprep.mubr.bf16.mxu0 %v54_v54 }
  0x49   :  { %532 = vmatmul.mubr.bf16.vlgmr.msra.gmra.mrb[0].mxu1 %v51_v41  ;;  %733 = vmatprep.subr.bf16.mxu0 %v802_v42 }
  0x4a   :  { %757 = vmatprep.mubr.msk.bf16.mxu1 %vm894_vm0, %v893_v44  ;;  %756 = vmatpush3.bf16.msra.mxu1 %v816_v52 }
  0x4c   :  { %734 = vmatpush3.bf16.msra.mxu0 %v803_v43 }
  0x4d   :  { %735 = vmatprep.subr.bf16.mxu0 %v804_v45 }
  0x50   :  { %736 = vmatpush3.bf16.msra.mxu0 %v805_v46 }
  0x51   :  { %737 = vmatprep.subr.bf16.mxu0 %v806_v47  ;;  %758 = vmatmul.mubr.msk.bf16.vlgmr.msra.gmra.mrb[4].mxu1 %vm455_vm1, %v55_v57 }
  0x54   :  { %738 = vmatpush3.bf16.msra.mxu0 %v807_v48 }
  0x55   :  { %739 = vmatprep.subr.bf16.mxu0 %v808_v49 }
  0x58   :  { %740 = vmatpush3.bf16.msra.mxu0 %v809_v50 }
  0x59   :  { %741 = vmatprep.subr.bf16.mxu0 %v810_v51 }
  0x5c   :  { %742 = vmatpush3.bf16.msra.mxu0 %v811_v56 }
  0x5d   :  { %743 = vmatprep.subr.bf16.mxu0 %v812_v58 }
  0x60   :  { %744 = vmatpush3.bf16.msra.mxu0 %v813_v59 }
  0x61   :  { %745 = vmatprep.subr.bf16.mxu0 %v814_v60 }
  0x64   :  { %746 = vmatpush3.bf16.msra.mxu0 %v815_v61 }
  0x67   :  { %572 = vmatmul.mubr.bf16.vlgmr.msra.gmra.mrb[4].mxu0 %v53_v63 }
 0x11a   :  { %v703_v0 = vpop.f32.mrb[0].mxu0 }
 0x11b   :  { %v704_v2 = vpop.f32.mrb[1].mxu0 }
 0x11c   :  { %v705_v3 = vadd.f32 %v704_v2, %v703_v0  ;;  %v706_v4 = vpop.f32.mrb[2].mxu0  ;;  %v725_v5 = vpop.f32.mrb[0].mxu1 }
 0x11d   :  { %v707_v6 = vpop.f32.mrb[3].mxu0  ;;  %v726_v8 = vpop.f32.mrb[1].mxu1 }
 0x11e   :  { %v494_v7 = vadd.f32 %v705_v3, %v636_v1  ;;  %v727_v9 = vadd.f32 %v726_v8, %v725_v5  ;;  %v728_v10 = vpop.f32.mrb[2].mxu1 }
 0x11f   :  { %v729_v11 = vpop.f32.mrb[3].mxu1 }
 0x120   :  { %v534_v12 = vadd.f32 %v727_v9, %v494_v7 }
 0x124   :  { %v613_v13 = vpop.f32.mrb[4].mxu1 }
 0x125   :  { %v759_v14 = vpop.f32.mrb[5].mxu1 }
 0x126   :  { %v616_v15 = vpop.f32.mrb[6].mxu1 }
 0x127   :  { %v760_v16 = vpop.f32.mrb[7].mxu1 }
 0x13a   :  { %v747_v17 = vpop.f32.mrb[4].mxu0 }
 0x13b   :  { %v748_v18 = vpop.f32.mrb[5].mxu0 }
 0x13c   :  { %v749_v19 = vadd.f32 %v748_v18, %v747_v17  ;;  %v750_v20 = vpop.f32.mrb[6].mxu0 }
 0x13d   :  { %v751_v21 = vpop.f32.mrb[7].mxu0 }
 0x13e   :  { %v574_v22 = vadd.f32 %v749_v19, %v534_v12 }
 0x140   :  { %v614_v23 = vadd.f32 %v613_v13, %v574_v22 }
 0x142   :  { %619 = vst [vmem:[#allocation7] sm:$0xff] %v614_v23 }
 0x143   :  { %872 = shalt.err (!%p869_p6)
}
 0x144   :  { %s873_s15 = scalar_lea.hbm %s965_s3, 128 }
 0x145   :  { %p874_p7 = scmp.ne.s32.totalorder %s965_s3, %s873_s15  ;;  %p877_p8 = scmp.lt.u32.totalorder %s873_s15, %s965_s3 }
 0x147   :  { %p879_p9 = pnand %p877_p8, %p874_p7 }
 0x149   :  { %882 = shalt.err (!%p879_p9)
}
 0x14a   :  { %629 = dma.vmem_to_hbm [thread:$0]  %s627_s11, 128, %s965_s3, [#allocation4]  }
 0x14b   :  { %887 = dma.done.wait [#allocation4], 128  }
 0x14c   :  { %888 = vsyncadd [#allocation4], 4294967168 }
 0x14d   :  { %633 = vsyncpa [#allocation3], 1 }
 0x14e   :  { %634 = vsyncpa [#allocation6], 1 }
 0x14f   :  { %635 = vsyncpa [#allocation4], 1 }

</bundles_post_ra>
